<compile_context>
chip_gen: v5e
topology: v5e:2x2
jax: 0.10.0
libtpu: 0.0.40
codegen_flags: <defaults>
</compile_context>

<pallas_src>
import functools

import jax
import jax.numpy as jnp
from jax.experimental import pallas as pl
from jax.experimental.pallas import tpu as pltpu

_EPS = 1e-6  # PyTorch F.pairwise_distance default eps


def _triplet_kernel(a_ref, p_ref, n_ref, out_ref, *, margin, true_b, tile_b):
    # (TB, D) tile of each input; reduction axis D is the lane axis.
    a = a_ref[...].astype(jnp.float32)
    p = p_ref[...].astype(jnp.float32)
    n = n_ref[...].astype(jnp.float32)

    dp = a - p + _EPS
    dn = a - n + _EPS

    pos_dist = jnp.sqrt(jnp.sum(dp * dp, axis=-1, keepdims=True))  # (TB, 1)
    neg_dist = jnp.sqrt(jnp.sum(dn * dn, axis=-1, keepdims=True))  # (TB, 1)

    hinge = jnp.maximum(pos_dist - neg_dist + margin, 0.0)         # (TB, 1)

    # Mask rows that are zero-padding past the true batch size (a padded row
    # would otherwise contribute relu(0 - 0 + margin) = margin).
    row = pl.program_id(0) * tile_b + jax.lax.broadcasted_iota(
        jnp.int32, (tile_b, 1), 0)
    hinge = jnp.where(row < true_b, hinge, 0.0)

    partial = jnp.sum(hinge)                                       # scalar
    # Lane-dense partial-sum block: one unmasked (8,128) store per tile.
    out_ref[...] = jnp.full(out_ref.shape, partial, dtype=jnp.float32)


def _round_up(x, m):
    return ((x + m - 1) // m) * m


def _choose_tile_b(batch, dim, tile_b):
    # Align to 16 rows (good for both f32 and bf16 sublane packing).
    tb = min(tile_b, _round_up(batch, 16))
    # VMEM budget: 3 inputs x 2 pipeline buffers x TB x D x 4B <= ~12 MiB
    # (safe under v5e's 16 MiB scoped default and v7x's tighter VMEM).
    budget = 12 * 1024 * 1024
    max_tb = max(16, (budget // (3 * 2 * dim * 4)) // 16 * 16)
    tb = min(tb, max_tb)
    return max(16, (tb // 16) * 16)


def triplet_loss(anchor, positive, negative, margin=0.3, tile_b=512):
    assert anchor.shape == positive.shape == negative.shape
    assert anchor.ndim == 2
    B, D = anchor.shape

    tb = _choose_tile_b(B, D, tile_b)
    num_tiles = pl.cdiv(B, tb)
    pad_b = num_tiles * tb
    if pad_b != B:
        pad = ((0, pad_b - B), (0, 0))
        anchor = jnp.pad(anchor, pad)
        positive = jnp.pad(positive, pad)
        negative = jnp.pad(negative, pad)

    kernel = functools.partial(
        _triplet_kernel, margin=float(margin), true_b=B, tile_b=tb)

    in_spec = pl.BlockSpec((tb, D), lambda i: (i, 0))
    partials = pl.pallas_call(
        kernel,
        out_shape=jax.ShapeDtypeStruct((num_tiles, 8, 128), jnp.float32),
        grid_spec=pltpu.PrefetchScalarGridSpec(
            num_scalar_prefetch=0,
            grid=(num_tiles,),
            in_specs=[in_spec, in_spec, in_spec],
            out_specs=pl.BlockSpec((1, 8, 128), lambda i: (i, 0, 0)),
        ),
        compiler_params=pltpu.CompilerParams(
            dimension_semantics=("parallel",)),
    )(anchor, positive, negative)

    # Tiny final reduction over per-tile partial sums, divide by the TRUE B.
    return jnp.sum(partials[:, 0, 0]) / B


def _ref_triplet_loss(anchor, positive, negative, margin=0.3):
    # Pure-JAX reference mirroring PyTorch F.pairwise_distance semantics.
    pos = jnp.sqrt(jnp.sum((anchor - positive + _EPS) ** 2, axis=-1))
    neg = jnp.sqrt(jnp.sum((anchor - negative + _EPS) ** 2, axis=-1))
    return jnp.mean(jnp.maximum(pos - neg + margin, 0.0))


if __name__ == "__main__":
    key = jax.random.PRNGKey(0)
    k1, k2, k3 = jax.random.split(key, 3)
    # ECAPA-TDNN embeddings: (batch, 192). B=10 exercises the padding/mask path.
    B, D = 10, 192
    anchor = jax.random.normal(k1, (B, D), dtype=jnp.float32)
    positive = jax.random.normal(k2, (B, D), dtype=jnp.float32)
    negative = jax.random.normal(k3, (B, D), dtype=jnp.float32)

    out = triplet_loss(anchor, positive, negative, margin=0.3)
    out = jax.block_until_ready(out)

    ref = _ref_triplet_loss(anchor, positive, negative, margin=0.3)
    assert jnp.allclose(out, ref, atol=1e-5, rtol=1e-5), (out, ref)
    print("KERNEL_OK")
</pallas_src>

<mosaic_0001>
module attributes {stable_mosaic.version = 11 : i64} {
  func.func @_triplet_kernel(%arg0: i32, %arg1: memref<16x192xf32, #tpu.memory_space<vmem>>, %arg2: memref<16x192xf32, #tpu.memory_space<vmem>>, %arg3: memref<16x192xf32, #tpu.memory_space<vmem>>, %arg4: memref<1x8x128xf32, #tpu.memory_space<vmem>>) attributes {dimension_semantics = [#tpu.dimension_semantics<parallel>], iteration_bounds = array<i64: 1>, scalar_prefetch = 0 : i64, scratch_operands = 0 : i64, tpu.core_type = #tpu.core_type<tc>, window_params = [{transform_indices = @transform_0, window_bounds = array<i64: 16, 192>}, {transform_indices = @transform_1, window_bounds = array<i64: 16, 192>}, {transform_indices = @transform_2, window_bounds = array<i64: 16, 192>}, {transform_indices = @transform_3, window_bounds = array<i64: 1, 8, 128>}]} {
    %c0 = arith.constant 0 : index
    %c0_0 = arith.constant 0 : index
    %0 = vector.load %arg1[%c0, %c0_0] : memref<16x192xf32, #tpu.memory_space<vmem>>, vector<16x192xf32>
    %c0_1 = arith.constant 0 : index
    %c0_2 = arith.constant 0 : index
    %1 = vector.load %arg2[%c0_1, %c0_2] : memref<16x192xf32, #tpu.memory_space<vmem>>, vector<16x192xf32>
    %c0_3 = arith.constant 0 : index
    %c0_4 = arith.constant 0 : index
    %2 = vector.load %arg3[%c0_3, %c0_4] : memref<16x192xf32, #tpu.memory_space<vmem>>, vector<16x192xf32>
    %3 = arith.subf %0, %1 : vector<16x192xf32>
    %cst = arith.constant 9.99999997E-7 : f32
    %4 = vector.broadcast %cst : f32 to vector<16x192xf32>
    %5 = arith.addf %3, %4 : vector<16x192xf32>
    %6 = arith.subf %0, %2 : vector<16x192xf32>
    %cst_5 = arith.constant 9.99999997E-7 : f32
    %7 = vector.broadcast %cst_5 : f32 to vector<16x192xf32>
    %8 = arith.addf %6, %7 : vector<16x192xf32>
    %9 = arith.mulf %5, %5 : vector<16x192xf32>
    %cst_6 = arith.constant dense<0.000000e+00> : vector<16xf32>
    %10 = vector.multi_reduction <add>, %9, %cst_6 [1] : vector<16x192xf32> to vector<16xf32>
    %11 = vector.shape_cast %10 : vector<16xf32> to vector<16x1xf32>
    %12 = math.sqrt %11 : vector<16x1xf32>
    %13 = arith.mulf %8, %8 : vector<16x192xf32>
    %cst_7 = arith.constant dense<0.000000e+00> : vector<16xf32>
    %14 = vector.multi_reduction <add>, %13, %cst_7 [1] : vector<16x192xf32> to vector<16xf32>
    %15 = vector.shape_cast %14 : vector<16xf32> to vector<16x1xf32>
    %16 = math.sqrt %15 : vector<16x1xf32>
    %17 = arith.subf %12, %16 : vector<16x1xf32>
    %cst_8 = arith.constant 3.000000e-01 : f32
    %18 = vector.broadcast %cst_8 : f32 to vector<16x1xf32>
    %19 = arith.addf %17, %18 : vector<16x1xf32>
    %cst_9 = arith.constant 0.000000e+00 : f32
    %20 = vector.broadcast %cst_9 : f32 to vector<16x1xf32>
    %21 = arith.maximumf %19, %20 : vector<16x1xf32>
    %c16_i32 = arith.constant 16 : i32
    %22 = arith.muli %arg0, %c16_i32 : i32
    %23 = tpu.iota {dimensions = array<i32: 0>} : vector<16x1xi32>
    %24 = vector.broadcast %22 : i32 to vector<16x1xi32>
    %25 = arith.addi %24, %23 : vector<16x1xi32>
    %c10_i32 = arith.constant 10 : i32
    %26 = vector.broadcast %c10_i32 : i32 to vector<16x1xi32>
    %27 = arith.cmpi slt, %25, %26 : vector<16x1xi32>
    %cst_10 = arith.constant 0.000000e+00 : f32
    %28 = vector.broadcast %cst_10 : f32 to vector<16x1xf32>
    %29 = arith.select %27, %21, %28 : vector<16x1xi1>, vector<16x1xf32>
    %30 = vector.shape_cast %29 : vector<16x1xf32> to vector<1x16x1xf32>
    %cst_11 = arith.constant dense<0.000000e+00> : vector<1xf32>
    %31 = vector.multi_reduction <add>, %30, %cst_11 [1, 2] : vector<1x16x1xf32> to vector<1xf32>
    %32 = vector.shape_cast %31 : vector<1xf32> to vector<1x1x1xf32>
    %33 = vector.extract %32[0, 0, 0] : f32 from vector<1x1x1xf32>
    %34 = vector.broadcast %33 : f32 to vector<1x8x128xf32>
    %c0_12 = arith.constant 0 : index
    %c0_13 = arith.constant 0 : index
    %c0_14 = arith.constant 0 : index
    %35 = vector.load %arg4[%c0_12, %c0_13, %c0_14] : memref<1x8x128xf32, #tpu.memory_space<vmem>>, vector<1x8x128xf32>
    tpu.vector_store %arg4[%c0_12, %c0_13, %c0_14], %34 {strides = array<i32>} : memref<1x8x128xf32, #tpu.memory_space<vmem>>, vector<1x8x128xf32>,
    return
  }
  func.func @transform_0(%arg0: i32) -> (i32, i32) {
    %c0_i32 = arith.constant 0 : i32
    %c0_i32_0 = arith.constant 0 : i32
    return %arg0, %c0_i32 : i32, i32
  }
  func.func @transform_1(%arg0: i32) -> (i32, i32) {
    %c0_i32 = arith.constant 0 : i32
    %c0_i32_0 = arith.constant 0 : i32
    return %arg0, %c0_i32 : i32, i32
  }
  func.func @transform_2(%arg0: i32) -> (i32, i32) {
    %c0_i32 = arith.constant 0 : i32
    %c0_i32_0 = arith.constant 0 : i32
    return %arg0, %c0_i32 : i32, i32
  }
  func.func @transform_3(%arg0: i32) -> (i32, i32, i32) {
    %c0_i32 = arith.constant 0 : i32
    %c0_i32_0 = arith.constant 0 : i32
    %c0_i32_1 = arith.constant 0 : i32
    return %arg0, %c0_i32, %c0_i32_0 : i32, i32, i32
  }
}

</mosaic_0001>

<bundles_post_ra>
// kernel: tpu_custom_call.1
= control target key start
LH: loop header
LB: loop body
LE: loop exit
PB: predicated region body
PF: predicated region fallthrough
CT: control target
= control target key end

     0   :  { %8 = vsyncpa [#allocation3], 0  ;;  %s375_s0 = inlined_call_operand.hbm [shape: f32[16,192], index: 0, kind: input, shape index: {}]   ;;  %s376_s1 = inlined_call_operand.hbm [shape: f32[16,192], index: 1, kind: input, shape index: {}]   ;;  %s377_s2 = inlined_call_operand.hbm [shape: f32[16,192], index: 2, kind: input, shape index: {}]   ;;  %s378_s3 = inlined_call_operand.hbm [shape: f32[1,8,128], index: 3, kind: output, shape index: {}]  }
   0x1   :  { %9 = vsyncpa [#allocation6], 0 }
   0x2   :  { %10 = vsyncpa [#allocation4], 0  ;;  %s28_s14 = sshll.u32 %s376_s1, 4  ;;  %s331_s15 = smov [#allocation5]   ;;  %s29_s14 = int_to_ptr.hbm [resolvable:$true] %s28_s14 }
   0x3   :  { %s30_s16 = sshll.u32 %s331_s15, 4  ;;  %s15_s19 = sshll.u32 %s375_s0, 4  ;;  %s31_s16 = int_to_ptr.vmem [resolvable:$true] %s30_s16  ;;  %s16_s19 = int_to_ptr.hbm [resolvable:$true] %s15_s19 }
   0x4   :  { %s332_s20 = smov 256   ;;  %s333_s21 = smov 16  }
   0x5   :  { %36 = dma.hbm_to_vmem [thread:$0]  %s29_s14, 512, %s31_s16, [#allocation6], %s332_s20, %s332_s20, %s333_s21  }
   0x6   :  { %s334_s22 = smov [#allocation2]   ;;  %s41_s26 = sshll.u32 %s377_s2, 4  ;;  %s42_s26 = int_to_ptr.hbm [resolvable:$true] %s41_s26 }
   0x7   :  { %s17_s23 = sshll.u32 %s334_s22, 4  ;;  %s335_s1 = smov [#allocation7]   ;;  %s18_s23 = int_to_ptr.vmem [resolvable:$true] %s17_s23 }
   0x8   :  { %23 = dma.hbm_to_vmem [thread:$0]  %s16_s19, 512, %s18_s23, [#allocation3], %s332_s20, %s332_s20, %s333_s21  }
   0x9   :  { %s43_s27 = sshll.u32 %s335_s1, 4  ;;  %s44_s27 = int_to_ptr.vmem [resolvable:$true] %s43_s27 }
   0xa   :  { %49 = dma.hbm_to_vmem [thread:$0]  %s42_s26, 512, %s44_s27, [#allocation6], %s332_s20, %s332_s20, %s333_s21  }
   0xb   :  { %325 = dma.done.wait [#allocation3], 512  }
   0xc   :  { %326 = vsyncadd [#allocation3], 4294966784 }
   0xd   :  { %327 = dma.done.wait [#allocation6], 1024  }
   0xe   :  { %328 = vsyncadd [#allocation6], 4294966272  ;;  %v64_v0 = vld [vmem:[#allocation2 + $0x10] sm:$0xff]  ;;  %v65_v1 = vld [vmem:[#allocation2 + $0x18] sm:$0xff]  ;;  %vm94_vm0 = vcmask 523264   ;;  %vm180_vm10 = vcmask 7168  }
   0xf   :  { %v68_v2 = vld [vmem:[#allocation5 + $0x10] sm:$0xff]  ;;  %v69_v3 = vld [vmem:[#allocation5 + $0x18] sm:$0xff]  ;;  %v62_v5 = vld [vmem:[#allocation2] sm:$0xff]  ;;  %s202_s28 = sshll.u32 %s378_s3, 4  ;;  %s336_s29 = smov [#allocation8]   ;;  %s203_s28 = int_to_ptr.hbm [resolvable:$true] %s202_s28 }
  0x10   :  { %v76_v4 = vsub.f32 %v64_v0, %v68_v2  ;;  %v63_v6 = vld [vmem:[#allocation2 + $0x8] sm:$0xff]  ;;  %v77_v7 = vsub.f32 %v65_v1, %v69_v3  ;;  %v66_v8 = vld [vmem:[#allocation5] sm:$0xff]  ;;  %v72_v10 = vld [vmem:[#allocation7 + $0x10] sm:$0xff]  ;;  %s200_s30 = sshll.u32 %s336_s29, 4  ;;  %s201_s30 = int_to_ptr.vmem [resolvable:$true] %s200_s30 }
  0x11   :  { %v67_v9 = vld [vmem:[#allocation5 + $0x8] sm:$0xff]  ;;  %v74_v12 = vsub.f32 %v62_v5, %v66_v8  ;;  %v73_v14 = vld [vmem:[#allocation7 + $0x18] sm:$0xff]  ;;  %v84_v15 = vsub.f32 %v64_v0, %v72_v10  ;;  %v70_v16 = vld [vmem:[#allocation7] sm:$0xff]  ;;  %v170_v0 = vlaneseq }
  0x12   :  { %v80_v11 = vadd.f32 1e-06, %v76_v4  ;;  %v75_v13 = vsub.f32 %v63_v6, %v67_v9  ;;  %v71_v17 = vld [vmem:[#allocation7 + $0x8] sm:$0xff]  ;;  %v81_v18 = vadd.f32 1e-06, %v77_v7  ;;  %v85_v19 = vsub.f32 %v65_v1, %v73_v14 }
  0x13   :  { %v82_v20 = vsub.f32 %v62_v5, %v70_v16  ;;  %v83_v21 = vsub.f32 %v63_v6, %v71_v17  ;;  %v78_v23 = vadd.f32 1e-06, %v74_v12  ;;  %v88_v30 = vadd.f32 1e-06, %v84_v15 }
  0x14   :  { %v92_v22 = vmul.f32 %v80_v11, %v80_v11  ;;  %v79_v24 = vadd.f32 1e-06, %v75_v13  ;;  %v93_v25 = vmul.f32 %v81_v18, %v81_v18  ;;  %v89_v26 = vadd.f32 1e-06, %v85_v19 }
  0x15   :  { %v87_v27 = vadd.f32 1e-06, %v83_v21  ;;  %v90_v28 = vmul.f32 %v78_v23, %v78_v23  ;;  %v86_v33 = vadd.f32 1e-06, %v82_v20  ;;  %v129_v38 = vmul.f32 %v88_v30, %v88_v30 }
  0x16   :  { %v91_v29 = vmul.f32 %v79_v24, %v79_v24  ;;  %v99_v31 = vsel %vm94_vm0, %v93_v25, 0.0  ;;  %v130_v32 = vmul.f32 %v89_v26, %v89_v26  ;;  %v171_v7 = vshrl.u32 %v170_v0, 7 }
  0x17   :  { %v100_v34 = vadd.f32 %v99_v31, %v92_v22  ;;  %v128_v36 = vmul.f32 %v87_v27, %v87_v27  ;;  %v127_v40 = vmul.f32 %v86_v33, %v86_v33 }
  0x18   :  { %v95_v35 = vsel %vm94_vm0, %v91_v29, 0.0  ;;  %v135_v39 = vsel %vm94_vm0, %v130_v32, 0.0  ;;  %v172_v16 = vadd.s32 8, %v171_v7 }
  0x19   :  { %v96_v37 = vadd.f32 %v95_v35, %v90_v28  ;;  %101 = vadd.xlane.f32.xlu0 %v100_v34  ;;  %v131_v41 = vsel %vm94_vm0, %v128_v36, 0.0  ;;  %v136_v42 = vadd.f32 %v135_v39, %v129_v38 }
  0x1a   :  { %v132_v43 = vadd.f32 %v131_v41, %v127_v40  ;;  %vm177_vm9 = vcmp.lt.s32.totalorder %v172_v16, 10 }
  0x1b   :  { %97 = vadd.xlane.f32.xlu1 %v96_v37 }
  0x21   :  { %137 = vadd.xlane.f32.xlu0 %v136_v42 }
  0x23   :  { %133 = vadd.xlane.f32.xlu1 %v132_v43 }
  0x8c   :  { %v102_v44 = vpop.xlane.xlu0 %101 }
  0x8d   :  { %221 = vrsqrt.f32 %v102_v44  ;;  %vm122_vm1 = vcmp.eq.f32.partialorder %v102_v44, inf  ;;  %vm124_vm2 = vcmp.eq.f32.partialorder %v102_v44, 0.0  ;;  %v125_v11 = vand.u32 2147483648, %v102_v44 }
  0x8e   :  { %v98_v45 = vpop.xlane.xlu1 %97 }
  0x8f   :  { %223 = vrsqrt.f32 %v98_v45  ;;  %vm110_vm3 = vcmp.eq.f32.partialorder %v98_v45, inf  ;;  %vm112_vm4 = vcmp.eq.f32.partialorder %v98_v45, 0.0  ;;  %v113_v14 = vand.u32 2147483648, %v98_v45 }
  0x93   :  { %v222_v46 = vpop.eup %221 }
  0x94   :  { %v116_v48 = vmul.f32 %v222_v46, %v102_v44  ;;  %v138_v49 = vpop.xlane.xlu0 %137 }
  0x95   :  { %v224_v47 = vpop.eup %223  ;;  %225 = vrsqrt.f32 %v138_v49  ;;  %vm158_vm5 = vcmp.eq.f32.partialorder %v138_v49, inf  ;;  %v161_v19 = vand.u32 2147483648, %v138_v49  ;;  %vm160_vm7 = vcmp.eq.f32.partialorder %v138_v49, 0.0 }
  0x96   :  { %v104_v50 = vmul.f32 %v224_v47, %v98_v45  ;;  %v134_v51 = vpop.xlane.xlu1 %133  ;;  %v117_v52 = vmul.f32 %v222_v46, %v116_v48 }
  0x97   :  { %227 = vrsqrt.f32 %v134_v51  ;;  %vm146_vm6 = vcmp.eq.f32.partialorder %v134_v51, inf  ;;  %v149_v20 = vand.u32 2147483648, %v134_v51  ;;  %vm148_vm8 = vcmp.eq.f32.partialorder %v134_v51, 0.0 }
  0x98   :  { %v105_v53 = vmul.f32 %v224_v47, %v104_v50  ;;  %v118_v54 = vmul.f32 0.5, %v117_v52 }
  0x9a   :  { %v106_v55 = vmul.f32 0.5, %v105_v53  ;;  %v119_v56 = vsub.f32 1.5, %v118_v54 }
  0x9b   :  { %v226_v57 = vpop.eup %225 }
  0x9c   :  { %v107_v58 = vsub.f32 1.5, %v106_v55  ;;  %v152_v60 = vmul.f32 %v226_v57, %v138_v49  ;;  %v120_v63 = vmul.f32 %v222_v46, %v119_v56 }
  0x9d   :  { %v228_v59 = vpop.eup %227 }
  0x9e   :  { %v140_v61 = vmul.f32 %v228_v59, %v134_v51  ;;  %v153_v62 = vmul.f32 %v226_v57, %v152_v60  ;;  %v108_v2 = vmul.f32 %v224_v47, %v107_v58  ;;  %v121_v6 = vmul.f32 %v120_v63, %v102_v44 }
  0xa0   :  { %v141_v1 = vmul.f32 %v228_v59, %v140_v61  ;;  %v154_v3 = vmul.f32 0.5, %v153_v62  ;;  %v109_v9 = vmul.f32 %v108_v2, %v98_v45  ;;  %v123_v15 = vsel %vm122_vm1, %v102_v44, %v121_v6 }
  0xa1   :  { %v126_v22 = vsel %vm124_vm2, %v125_v11, %v123_v15 }
  0xa2   :  { %v142_v4 = vmul.f32 0.5, %v141_v1  ;;  %v155_v5 = vsub.f32 1.5, %v154_v3  ;;  %v111_v17 = vsel %vm110_vm3, %v98_v45, %v109_v9 }
  0xa3   :  { %v114_v25 = vsel %vm112_vm4, %v113_v14, %v111_v17 }
  0xa4   :  { %v143_v8 = vsub.f32 1.5, %v142_v4  ;;  %v156_v10 = vmul.f32 %v226_v57, %v155_v5 }
  0xa6   :  { %v144_v12 = vmul.f32 %v228_v59, %v143_v8  ;;  %v157_v13 = vmul.f32 %v156_v10, %v138_v49 }
  0xa8   :  { %v145_v18 = vmul.f32 %v144_v12, %v134_v51  ;;  %v159_v21 = vsel %vm158_vm5, %v138_v49, %v157_v13 }
  0xa9   :  { %v162_v24 = vsel %vm160_vm7, %v161_v19, %v159_v21 }
  0xaa   :  { %v147_v23 = vsel %vm146_vm6, %v134_v51, %v145_v18  ;;  %v164_v27 = vsub.f32 %v126_v22, %v162_v24 }
  0xab   :  { %v150_v26 = vsel %vm148_vm8, %v149_v20, %v147_v23 }
  0xac   :  { %v163_v28 = vsub.f32 %v114_v25, %v150_v26  ;;  %v166_v29 = vadd.f32 0.3, %v164_v27 }
  0xae   :  { %v165_v30 = vadd.f32 0.3, %v163_v28  ;;  %v168_v31 = vmax.f32 %v166_v29, 0.0 }
  0xb0   :  { %v167_v32 = vmax.f32 %v165_v30, 0.0  ;;  %v179_v33 = vsel %vm177_vm9, %v168_v31, 0.0 }
  0xb1   :  { %v182_v35 = vsel %vm180_vm10, %v179_v33, 0.0 }
  0xb2   :  { %v181_v34 = vsel %vm180_vm10, %v167_v32, 0.0 }
  0xb3   :  { %v183_v36 = vadd.f32 %v182_v35, %v181_v34 }
  0xb5   :  { %184 = vadd.xlane.f32.xlu2 %v183_v36 }
 0x128   :  { %v185_v37 = vpop.xlane.xlu2 %184 }
 0x129   :  { %v186_v38 = vrot.slane %v185_v37, 4 }
 0x12b   :  { %v187_v39 = vadd.f32 %v186_v38, %v185_v37 }
 0x12d   :  { %v188_v40 = vrot.slane %v187_v39, 2 }
 0x12f   :  { %v189_v41 = vadd.f32 %v188_v40, %v187_v39 }
 0x131   :  { %v190_v42 = vrot.slane %v189_v41, 1 }
 0x133   :  { %v191_v43 = vadd.f32 %v190_v42, %v189_v41 }
 0x135   :  { %213 = vpush %v191_v43 }
 0x166   :  { %s214_s4 = spop %213 }
 0x167   :  { %v193_v44 = vstv %s214_s4 }
 0x168   :  { %194 = vst [vmem:[#allocation8] sm:$0xff] %v193_v44 }
 0x169   :  { %205 = dma.vmem_to_hbm [thread:$0]  %s201_s30, 128, %s203_s28, [#allocation4]  }
 0x16a   :  { %329 = dma.done.wait [#allocation4], 128  }
 0x16b   :  { %330 = vsyncadd [#allocation4], 4294967168 }
 0x16c   :  { %210 = vsyncpa [#allocation3], 1 }
 0x16d   :  { %211 = vsyncpa [#allocation6], 1 }
 0x16e   :  { %212 = vsyncpa [#allocation4], 1 }

</bundles_post_ra>
